<compile_context>
chip_gen: v6e
topology: v6e:2x2x1
jax: 0.10.0
libtpu: 0.0.40
codegen_flags: <defaults>
</compile_context>

<pallas_src>
import jax
import jax.numpy as jnp
from jax.experimental import pallas as pl
from jax.experimental.pallas import tpu as pltpu


def _round_up(n: int, m: int) -> int:
    return -(-n // m) * m


def mlp_kernel(x_ref, w1_ref, b1_ref, w2_ref, b2_ref, w3_ref, b3_ref, o_ref):
    # Cast the streamed tile to bf16 in-kernel (cheap VPU cast, hidden under the
    # software pipeline) so both matmuls are single-pass bf16 MXU ops.
    x = x_ref[...].astype(jnp.bfloat16)

    # Layer 1: [TB, D] @ [D, H] -> f32 accumulate, + bias, ReLU.
    h1 = jnp.dot(x, w1_ref[...], preferred_element_type=jnp.float32)
    h1 = jnp.maximum(h1 + b1_ref[...], 0.0)

    # Layer 2: [TB, H] @ [H, H] -> f32 accumulate, + bias, ReLU.
    h2 = jnp.dot(h1.astype(jnp.bfloat16), w2_ref[...],
                 preferred_element_type=jnp.float32)
    h2 = jnp.maximum(h2 + b2_ref[...], 0.0)

    # Layer 3 (H -> 1): VPU multiply + lane reduction instead of a [TB,H]x[H,1]
    # matmul (which would occupy a single MXU output column).  Scalar bias from SMEM.
    out = jnp.sum(h2 * w3_ref[...], axis=-1, keepdims=True) + b3_ref[0]  # (TB, 1) f32
    o_ref[...] = out.astype(o_ref.dtype)


def neural_net_forward(x, params, *, tb_target=1024):
    """x: [B, D] float32. Returns [B] float32 (matches NeuralNet.forward's .squeeze(1))."""
    w1, b1, w2, b2, w3, b3 = params
    B, D = x.shape
    H = w1.shape[1]

    # Lane/sublane-aligned batch tile, capped for VMEM headroom on all generations.
    TB = min(tb_target, _round_up(B, 128))
    B_pad = _round_up(B, TB)

    xf = x.astype(jnp.float32)
    if B_pad != B:
        xf = jnp.pad(xf, ((0, B_pad - B), (0, 0)))

    # Tiny, B-independent operands: pre-cast / reshape once in the wrapper.
    w1b = w1.astype(jnp.bfloat16)
    w2b = w2.astype(jnp.bfloat16)
    b1f = b1.reshape(1, H).astype(jnp.float32)
    b2f = b2.reshape(1, H).astype(jnp.float32)
    w3r = w3.reshape(1, H).astype(jnp.float32)   # row vector for the VPU reduce
    b3f = b3.reshape(1).astype(jnp.float32)      # scalar bias -> SMEM

    out = pl.pallas_call(
        mlp_kernel,
        out_shape=jax.ShapeDtypeStruct((B_pad, 1), jnp.float32),
        grid=(pl.cdiv(B_pad, TB),),
        in_specs=[
            pl.BlockSpec((TB, D), lambda i: (i, 0)),            # x: streamed tiles
            pl.BlockSpec((D, H), lambda i: (0, 0)),             # w1: resident
            pl.BlockSpec((1, H), lambda i: (0, 0)),             # b1: resident
            pl.BlockSpec((H, H), lambda i: (0, 0)),             # w2: resident
            pl.BlockSpec((1, H), lambda i: (0, 0)),             # b2: resident
            pl.BlockSpec((1, H), lambda i: (0, 0)),             # w3 row: resident
            pl.BlockSpec(memory_space=pltpu.MemorySpace.SMEM),  # b3 scalar
        ],
        out_specs=pl.BlockSpec((TB, 1), lambda i: (i, 0)),
        compiler_params=pltpu.CompilerParams(
            dimension_semantics=("parallel",),                  # megacore on v7x
        ),
    )(xf, w1b, b1f, w2b, b2f, w3r, b3f)

    return out[:B, 0]


def init_params(key, input_dim, hidden=64):
    """Deterministic PyTorch-style (uniform +/- 1/sqrt(fan_in)) init.

    Weights stored as [in, out] (transposed vs. PyTorch's [out, in]) so the
    kernel does plain row-major matmuls on the MXU.
    """
    ks = jax.random.split(key, 6)

    def lin(kw, kb, fan_in, fan_out):
        bound = 1.0 / float(fan_in) ** 0.5
        w = jax.random.uniform(kw, (fan_in, fan_out), jnp.float32, -bound, bound)
        b = jax.random.uniform(kb, (fan_out,), jnp.float32, -bound, bound)
        return w, b

    w1, b1 = lin(ks[0], ks[1], input_dim, hidden)
    w2, b2 = lin(ks[2], ks[3], hidden, hidden)
    w3, b3 = lin(ks[4], ks[5], hidden, 1)
    return (w1, b1, w2, b2, w3, b3)


if __name__ == "__main__":
    key = jax.random.PRNGKey(0)
    kx, kp = jax.random.split(key)

    B, D = 8, 32
    x = jax.random.normal(kx, (B, D), dtype=jnp.float32)
    params = init_params(kp, D)

    pred = jax.block_until_ready(neural_net_forward(x, params))

    # Pure-f32 reference (original module semantics); tolerance covers the bf16
    # rounding of the matmul operands inside the kernel (f32 accumulation kept).
    w1, b1, w2, b2, w3, b3 = params
    h1 = jnp.maximum(x @ w1 + b1[None, :], 0.0)
    h2 = jnp.maximum(h1 @ w2 + b2[None, :], 0.0)
    ref = (h2 @ w3 + b3[None, :])[:, 0]

    assert pred.shape == (B,), pred.shape
    err = jnp.max(jnp.abs(pred - ref))
    assert jnp.allclose(pred, ref, atol=5e-2, rtol=5e-2), f"mismatch vs reference: {err}"

    print("KERNEL_OK")
</pallas_src>

<mosaic_0001>
module attributes {stable_mosaic.version = 11 : i64} {
  func.func @mlp_kernel(%arg0: i32, %arg1: memref<128x32xf32, #tpu.memory_space<vmem>>, %arg2: memref<32x64xbf16, #tpu.memory_space<vmem>>, %arg3: memref<1x64xf32, #tpu.memory_space<vmem>>, %arg4: memref<64x64xbf16, #tpu.memory_space<vmem>>, %arg5: memref<1x64xf32, #tpu.memory_space<vmem>>, %arg6: memref<1x64xf32, #tpu.memory_space<vmem>>, %arg7: memref<1xf32, #tpu.memory_space<smem>>, %arg8: memref<128x1xf32, #tpu.memory_space<vmem>>) attributes {dimension_semantics = [#tpu.dimension_semantics<parallel>], iteration_bounds = array<i64: 1>, scalar_prefetch = 0 : i64, scratch_operands = 0 : i64, tpu.core_type = #tpu.core_type<tc>, window_params = [{transform_indices = @transform_0, window_bounds = array<i64: 128, 32>}, {pipeline_mode = #tpu.pipeline_mode<synchronous>, transform_indices = @transform_1, window_bounds = array<i64: 32, 64>}, {pipeline_mode = #tpu.pipeline_mode<synchronous>, transform_indices = @transform_2, window_bounds = array<i64: 1, 64>}, {pipeline_mode = #tpu.pipeline_mode<synchronous>, transform_indices = @transform_3, window_bounds = array<i64: 64, 64>}, {pipeline_mode = #tpu.pipeline_mode<synchronous>, transform_indices = @transform_4, window_bounds = array<i64: 1, 64>}, {pipeline_mode = #tpu.pipeline_mode<synchronous>, transform_indices = @transform_5, window_bounds = array<i64: 1, 64>}, {transform_indices = @transform_6, window_bounds = array<i64: 1>}, {transform_indices = @transform_7, window_bounds = array<i64: 128, 1>}]} {
    %c0 = arith.constant 0 : index
    %c0_0 = arith.constant 0 : index
    %0 = vector.load %arg1[%c0, %c0_0] : memref<128x32xf32, #tpu.memory_space<vmem>>, vector<128x32xf32>
    %1 = arith.truncf %0 : vector<128x32xf32> to vector<128x32xbf16>
    %c0_1 = arith.constant 0 : index
    %c0_2 = arith.constant 0 : index
    %2 = vector.load %arg2[%c0_1, %c0_2] : memref<32x64xbf16, #tpu.memory_space<vmem>>, vector<32x64xbf16>
    %cst = arith.constant dense<0.000000e+00> : vector<128x64xf32>
    %3 = tpu.matmul %1, %2, %cst {dimension_numbers = #tpu.dot_dimension_numbers<[1], [0], [0], [1], [0, 0, 1, 1], [], []>} : vector<128x32xbf16>, vector<32x64xbf16>, vector<128x64xf32> -> vector<128x64xf32>
    %c0_3 = arith.constant 0 : index
    %c0_4 = arith.constant 0 : index
    %4 = vector.load %arg3[%c0_3, %c0_4] : memref<1x64xf32, #tpu.memory_space<vmem>>, vector<1x64xf32>
    %5 = vector.broadcast %4 : vector<1x64xf32> to vector<128x64xf32>
    %6 = arith.addf %3, %5 : vector<128x64xf32>
    %cst_5 = arith.constant 0.000000e+00 : f32
    %7 = vector.broadcast %cst_5 : f32 to vector<128x64xf32>
    %8 = arith.maximumf %6, %7 : vector<128x64xf32>
    %9 = arith.truncf %8 : vector<128x64xf32> to vector<128x64xbf16>
    %c0_6 = arith.constant 0 : index
    %c0_7 = arith.constant 0 : index
    %10 = vector.load %arg4[%c0_6, %c0_7] : memref<64x64xbf16, #tpu.memory_space<vmem>>, vector<64x64xbf16>
    %cst_8 = arith.constant dense<0.000000e+00> : vector<128x64xf32>
    %11 = tpu.matmul %9, %10, %cst_8 {dimension_numbers = #tpu.dot_dimension_numbers<[1], [0], [0], [1], [0, 0, 1, 1], [], []>} : vector<128x64xbf16>, vector<64x64xbf16>, vector<128x64xf32> -> vector<128x64xf32>
    %c0_9 = arith.constant 0 : index
    %c0_10 = arith.constant 0 : index
    %12 = vector.load %arg5[%c0_9, %c0_10] : memref<1x64xf32, #tpu.memory_space<vmem>>, vector<1x64xf32>
    %13 = vector.broadcast %12 : vector<1x64xf32> to vector<128x64xf32>
    %14 = arith.addf %11, %13 : vector<128x64xf32>
    %cst_11 = arith.constant 0.000000e+00 : f32
    %15 = vector.broadcast %cst_11 : f32 to vector<128x64xf32>
    %16 = arith.maximumf %14, %15 : vector<128x64xf32>
    %c0_12 = arith.constant 0 : index
    %c0_13 = arith.constant 0 : index
    %17 = vector.load %arg6[%c0_12, %c0_13] : memref<1x64xf32, #tpu.memory_space<vmem>>, vector<1x64xf32>
    %18 = vector.broadcast %17 : vector<1x64xf32> to vector<128x64xf32>
    %19 = arith.mulf %16, %18 : vector<128x64xf32>
    %cst_14 = arith.constant dense<0.000000e+00> : vector<128xf32>
    %20 = vector.multi_reduction <add>, %19, %cst_14 [1] : vector<128x64xf32> to vector<128xf32>
    %21 = vector.shape_cast %20 : vector<128xf32> to vector<128x1xf32>
    %c0_15 = arith.constant 0 : index
    %22 = memref.load %arg7[%c0_15] : memref<1xf32, #tpu.memory_space<smem>>
    %23 = vector.broadcast %22 : f32 to vector<128x1xf32>
    %24 = arith.addf %21, %23 : vector<128x1xf32>
    %c0_16 = arith.constant 0 : index
    %c0_17 = arith.constant 0 : index
    %25 = vector.load %arg8[%c0_16, %c0_17] : memref<128x1xf32, #tpu.memory_space<vmem>>, vector<128x1xf32>
    tpu.vector_store %arg8[%c0_16, %c0_17], %24 {strides = array<i32>} : memref<128x1xf32, #tpu.memory_space<vmem>>, vector<128x1xf32>,
    return
  }
  func.func @transform_0(%arg0: i32) -> (i32, i32) {
    %c0_i32 = arith.constant 0 : i32
    %c0_i32_0 = arith.constant 0 : i32
    return %arg0, %c0_i32 : i32, i32
  }
  func.func @transform_1(%arg0: i32) -> (i32, i32) {
    %c0_i32 = arith.constant 0 : i32
    %c0_i32_0 = arith.constant 0 : i32
    %c0_i32_1 = arith.constant 0 : i32
    return %c0_i32, %c0_i32_0 : i32, i32
  }
  func.func @transform_2(%arg0: i32) -> (i32, i32) {
    %c0_i32 = arith.constant 0 : i32
    %c0_i32_0 = arith.constant 0 : i32
    %c0_i32_1 = arith.constant 0 : i32
    return %c0_i32, %c0_i32_0 : i32, i32
  }
  func.func @transform_3(%arg0: i32) -> (i32, i32) {
    %c0_i32 = arith.constant 0 : i32
    %c0_i32_0 = arith.constant 0 : i32
    %c0_i32_1 = arith.constant 0 : i32
    return %c0_i32, %c0_i32_0 : i32, i32
  }
  func.func @transform_4(%arg0: i32) -> (i32, i32) {
    %c0_i32 = arith.constant 0 : i32
    %c0_i32_0 = arith.constant 0 : i32
    %c0_i32_1 = arith.constant 0 : i32
    return %c0_i32, %c0_i32_0 : i32, i32
  }
  func.func @transform_5(%arg0: i32) -> (i32, i32) {
    %c0_i32 = arith.constant 0 : i32
    %c0_i32_0 = arith.constant 0 : i32
    %c0_i32_1 = arith.constant 0 : i32
    return %c0_i32, %c0_i32_0 : i32, i32
  }
  func.func @transform_6(%arg0: i32) -> i32 {
    %c0_i32 = arith.constant 0 : i32
    %c0_i32_0 = arith.constant 0 : i32
    return %c0_i32 : i32
  }
  func.func @transform_7(%arg0: i32) -> (i32, i32) {
    %c0_i32 = arith.constant 0 : i32
    %c0_i32_0 = arith.constant 0 : i32
    return %arg0, %c0_i32 : i32, i32
  }
}

</mosaic_0001>

<bundles_post_ra>
// kernel: tpu_custom_call.1
= control target key start
LH: loop header
LB: loop body
LE: loop exit
PB: predicated region body
PF: predicated region fallthrough
CT: control target
= control target key end

     0   :  { %vm75_vm0 = vcmask 261120   ;;  %vm260_vm1 = vcmask 523264   ;;  %vm487_vm2 = vcmask 7168   ;;  %s855_s1 = inlined_call_operand.vmem [shape: bf16[32,64], index: 1, kind: input, shape index: {}]   ;;  %s856_s0 = inlined_call_operand.vmem [shape: f32[128,32], index: 0, kind: input, shape index: {}]   ;;  %s857_s3 = inlined_call_operand.vmem [shape: bf16[64,64], index: 3, kind: input, shape index: {}]   ;;  %s858_s2 = inlined_call_operand.vmem [shape: f32[1,64], index: 2, kind: input, shape index: {}]   ;;  %s859_s4 = inlined_call_operand.vmem [shape: f32[1,64], index: 4, kind: input, shape index: {}]   ;;  %s860_s5 = inlined_call_operand.vmem [shape: f32[1,64], index: 5, kind: input, shape index: {}]   ;;  %s861_s6 = inlined_call_operand.<no memory space> [shape: f32[1], index: 6, kind: input, shape index: {}]   ;;  %s862_s7 = inlined_call_operand.vmem [shape: f32[128,1], index: 7, kind: output, shape index: {}]  }
   0x1   :  { %v599_v0 = vld [vmem:[%s855_s1 + $0x8] sm:$0xff]   ;;  %v600_v1 = vld [vmem:[%s855_s1] sm:$0xff]   ;;  %v30_v5 = vld [vmem:[%s856_s0 + $0x10] sm:$0xff] }
   0x2   :  { %555 = vmatprep.subr.bf16.mxu0 %v599_v0  ;;  %v28_v2 = vld [vmem:[%s856_s0] sm:$0xff]  ;;  %v29_v3 = vld [vmem:[%s856_s0 + $0x8] sm:$0xff]  ;;  %v31_v6 = vld [vmem:[%s856_s0 + $0x18] sm:$0xff] }
   0x3   :  { %556 = vmatpush3.bf16.msra.mxu0 %v599_v0  ;;  %v44_v4 = vpack.c.bf16 %v29_v3, %v28_v2  ;;  %v32_v7 = vld [vmem:[%s856_s0 + $0x20] sm:$0xff]  ;;  %v33_v8 = vld [vmem:[%s856_s0 + $0x28] sm:$0xff]  ;;  %v45_v9 = vpack.c.bf16 %v31_v6, %v30_v5  ;;  %v601_v11 = vld [vmem:[%s857_s3 + $0x18] sm:$0xff]  }
   0x4   :  { %557 = vmatprep.subr.bf16.mxu0 %v600_v1  ;;  %v46_v10 = vpack.c.bf16 %v33_v8, %v32_v7  ;;  %575 = vmatprep.subr.bf16.mxu1 %v601_v11  ;;  %v34_v12 = vld [vmem:[%s856_s0 + $0x30] sm:$0xff]  ;;  %v35_v13 = vld [vmem:[%s856_s0 + $0x38] sm:$0xff]  ;;  %v36_v14 = vld [vmem:[%s856_s0 + $0x40] sm:$0xff] }
   0x5   :  { %559 = vmatprep.mubr.msk.bf16.mxu0 %vm75_vm0, %v44_v4  ;;  %576 = vmatpush3.bf16.msra.mxu1 %v601_v11  ;;  %v37_v15 = vld [vmem:[%s856_s0 + $0x48] sm:$0xff]  ;;  %v47_v16 = vpack.c.bf16 %v35_v13, %v34_v12  ;;  %v38_v18 = vld [vmem:[%s856_s0 + $0x50] sm:$0xff]  ;;  %v39_v19 = vld [vmem:[%s856_s0 + $0x58] sm:$0xff] }
   0x6   :  { %v48_v17 = vpack.c.bf16 %v37_v15, %v36_v14  ;;  %v40_v20 = vld [vmem:[%s856_s0 + $0x60] sm:$0xff]  ;;  %v41_v21 = vld [vmem:[%s856_s0 + $0x68] sm:$0xff]  ;;  %v49_v22 = vpack.c.bf16 %v39_v19, %v38_v18  ;;  %v42_v24 = vld [vmem:[%s856_s0 + $0x70] sm:$0xff] }
   0x7   :  { %558 = vmatpush3.bf16.msra.mxu0 %v600_v1  ;;  %v50_v23 = vpack.c.bf16 %v41_v21, %v40_v20  ;;  %v43_v25 = vld [vmem:[%s856_s0 + $0x78] sm:$0xff]  ;;  %v602_v27 = vld [vmem:[%s857_s3 + $0x10] sm:$0xff]   ;;  %v603_v28 = vld [vmem:[%s857_s3 + $0x8] sm:$0xff]  }
   0x8   :  { %v51_v26 = vpack.c.bf16 %v43_v25, %v42_v24  ;;  %577 = vmatprep.subr.bf16.mxu1 %v602_v27  ;;  %v604_v29 = vld [vmem:[%s857_s3] sm:$0xff]  }
   0x9   :  { %578 = vmatpush3.bf16.msra.mxu1 %v602_v27  ;;  %v508_v32 = vld [vmem:[%s858_s2] ss:$0 sm:$0xff] }
   0xa   :  { %560 = vmatmul.mubr.msk.bf16.vlgmr.msra.gmra.mxu0 %vm75_vm0, %v45_v9  ;;  %579 = vmatprep.subr.bf16.mxu1 %v603_v28  ;;  %v739_v27 = vld [vmem:[%s860_s5] ss:$0 sm:$0xff] }
   0xb   :  { %563 = vmatprep.mubr.msk.bf16.mxu0 %vm75_vm0, %v46_v10 }
   0xd   :  { %580 = vmatpush3.bf16.msra.mxu1 %v603_v28 }
   0xe   :  { %581 = vmatprep.subr.bf16.mxu1 %v604_v29 }
  0x11   :  { %582 = vmatpush3.bf16.msra.mxu1 %v604_v29 }
  0x12   :  { %564 = vmatmul.mubr.msk.bf16.gmra.mxu0 %vm75_vm0, %v47_v16 }
  0x13   :  { %567 = vmatprep.mubr.msk.bf16.mxu0 %vm75_vm0, %v48_v17 }
  0x1a   :  { %568 = vmatmul.mubr.msk.bf16.gmra.mxu0 %vm75_vm0, %v49_v22 }
  0x1b   :  { %571 = vmatprep.mubr.msk.bf16.mxu0 %vm75_vm0, %v50_v23  ;;  %v733_v23 = vld [vmem:[%s859_s4] ss:$0 sm:$0xff] }
  0x22   :  { %572 = vmatmul.mubr.msk.bf16.gmra.mxu0 %vm75_vm0, %v51_v26 }
  0xca   :  { %v561_v30 = vpop.f32.mrf.mxu0 }
  0xcb   :  { %v143_v36 = vadd.f32 %v561_v30, %v508_v32 }
  0xcc   :  { %v134_v31 = vpop.f32.mrf.mxu0 }
  0xcd   :  { %v135_v34 = vadd.f32 %v508_v32, %v134_v31  ;;  %v199_v43 = vmax.f32 %v143_v36, 0.0 }
  0xce   :  { %v562_v33 = vpop.f32.mrf.mxu0 }
  0xcf   :  { %v146_v35 = vadd.f32 %v562_v33, %v508_v32  ;;  %v197_v41 = vmax.f32 %v135_v34, 0.0 }
  0xd0   :  { %v137_v37 = vpop.f32.mrf.mxu0 }
  0xd1   :  { %v138_v38 = vadd.f32 %v508_v32, %v137_v37  ;;  %v200_v39 = vmax.f32 %v146_v35, 0.0 }
  0xd2   :  { %v565_v40 = vpop.f32.mrf.mxu0 }
  0xd3   :  { %v198_v42 = vmax.f32 %v138_v38, 0.0  ;;  %v214_v46 = vpack.c.bf16 %v200_v39, %v199_v43  ;;  %v159_v50 = vadd.f32 %v565_v40, %v508_v32 }
  0xd4   :  { %v150_v44 = vpop.f32.mrf.mxu0 }
  0xd5   :  { %v213_v45 = vpack.c.bf16 %v198_v42, %v197_v41  ;;  %v151_v48 = vadd.f32 %v508_v32, %v150_v44  ;;  %v203_v57 = vmax.f32 %v159_v50, 0.0 }
  0xd6   :  { %v566_v47 = vpop.f32.mrf.mxu0 }
  0xd7   :  { %v162_v49 = vadd.f32 %v566_v47, %v508_v32  ;;  %583 = vmatprep.mubr.msk.bf16.mxu1 %vm260_vm1, %v213_v45  ;;  %v201_v55 = vmax.f32 %v151_v48, 0.0 }
  0xd8   :  { %v153_v51 = vpop.f32.mrf.mxu0  ;;  %584 = vmatmul.mubr.msk.bf16.vlgmr.msra.gmra.mxu1 %vm260_vm1, %v214_v46 }
  0xd9   :  { %v154_v52 = vadd.f32 %v508_v32, %v153_v51  ;;  %v204_v53 = vmax.f32 %v162_v49, 0.0 }
  0xda   :  { %v569_v54 = vpop.f32.mrf.mxu0 }
  0xdb   :  { %v202_v56 = vmax.f32 %v154_v52, 0.0  ;;  %v216_v60 = vpack.c.bf16 %v204_v53, %v203_v57  ;;  %v175_v0 = vadd.f32 %v569_v54, %v508_v32 }
  0xdc   :  { %v166_v58 = vpop.f32.mrf.mxu0 }
  0xdd   :  { %v215_v59 = vpack.c.bf16 %v202_v56, %v201_v55  ;;  %v167_v62 = vadd.f32 %v508_v32, %v166_v58  ;;  %v207_v7 = vmax.f32 %v175_v0, 0.0 }
  0xde   :  { %v570_v61 = vpop.f32.mrf.mxu0 }
  0xdf   :  { %v178_v63 = vadd.f32 %v570_v61, %v508_v32  ;;  %587 = vmatprep.mubr.msk.bf16.mxu1 %vm260_vm1, %v215_v59  ;;  %v205_v5 = vmax.f32 %v167_v62, 0.0 }
  0xe0   :  { %v169_v1 = vpop.f32.mrf.mxu0  ;;  %588 = vmatmul.mubr.msk.bf16.gmra.mxu1 %vm260_vm1, %v216_v60 }
  0xe1   :  { %v170_v2 = vadd.f32 %v508_v32, %v169_v1  ;;  %v208_v3 = vmax.f32 %v178_v63, 0.0 }
  0xe2   :  { %v573_v4 = vpop.f32.mrf.mxu0 }
  0xe3   :  { %v206_v6 = vmax.f32 %v170_v2, 0.0  ;;  %v218_v10 = vpack.c.bf16 %v208_v3, %v207_v7  ;;  %v191_v14 = vadd.f32 %v573_v4, %v508_v32 }
  0xe4   :  { %v182_v8 = vpop.f32.mrf.mxu0 }
  0xe5   :  { %v217_v9 = vpack.c.bf16 %v206_v6, %v205_v5  ;;  %v183_v12 = vadd.f32 %v508_v32, %v182_v8  ;;  %v211_v20 = vmax.f32 %v191_v14, 0.0 }
  0xe6   :  { %v574_v11 = vpop.f32.mrf.mxu0 }
  0xe7   :  { %v194_v13 = vadd.f32 %v574_v11, %v508_v32  ;;  %591 = vmatprep.mubr.msk.bf16.mxu1 %vm260_vm1, %v217_v9  ;;  %v209_v18 = vmax.f32 %v183_v12, 0.0 }
  0xe8   :  { %v185_v15 = vpop.f32.mrf.mxu0  ;;  %592 = vmatmul.mubr.msk.bf16.gmra.mxu1 %vm260_vm1, %v218_v10 }
  0xe9   :  { %v186_v16 = vadd.f32 %v508_v32, %v185_v15  ;;  %v212_v17 = vmax.f32 %v194_v13, 0.0 }
  0xeb   :  { %v210_v19 = vmax.f32 %v186_v16, 0.0  ;;  %v220_v22 = vpack.c.bf16 %v212_v17, %v211_v20 }
  0xed   :  { %v219_v21 = vpack.c.bf16 %v210_v19, %v209_v18 }
  0xef   :  { %595 = vmatprep.mubr.msk.bf16.mxu1 %vm260_vm1, %v219_v21 }
  0xf0   :  { %596 = vmatmul.mubr.msk.bf16.gmra.mxu1 %vm260_vm1, %v220_v22 }
 0x198   :  { %v585_v24 = vpop.f32.mrf.mxu1 }
 0x199   :  { %v328_v25 = vadd.f32 %v585_v24, %v733_v23 }
 0x19a   :  { %v319_v26 = vpop.f32.mrf.mxu1 }
 0x19b   :  { %v384_v28 = vmax.f32 %v328_v25, 0.0  ;;  %v320_v29 = vadd.f32 %v733_v23, %v319_v26 }
 0x19c   :  { %v586_v30 = vpop.f32.mrf.mxu1 }
 0x19d   :  { %v382_v31 = vmax.f32 %v320_v29, 0.0  ;;  %v331_v32 = vadd.f32 %v586_v30, %v733_v23  ;;  %v407_v33 = vmul.f32 %v739_v27, %v384_v28 }
 0x19e   :  { %v322_v34 = vpop.f32.mrf.mxu1 }
 0x19f   :  { %v385_v35 = vmax.f32 %v331_v32, 0.0  ;;  %v323_v36 = vadd.f32 %v733_v23, %v322_v34  ;;  %v427_v37 = vsel %vm260_vm1, %v407_v33, 0.0  ;;  %v405_v38 = vmul.f32 %v739_v27, %v382_v31 }
 0x1a0   :  { %428 = vadd.xlane.f32.xlu1 %v427_v37  ;;  %v589_v39 = vpop.f32.mrf.mxu1 }
 0x1a1   :  { %v383_v40 = vmax.f32 %v323_v36, 0.0  ;;  %v344_v41 = vadd.f32 %v589_v39, %v733_v23  ;;  %v421_v42 = vsel %vm260_vm1, %v405_v38, 0.0  ;;  %v408_v43 = vmul.f32 %v739_v27, %v385_v35 }
 0x1a2   :  { %v335_v44 = vpop.f32.mrf.mxu1  ;;  %422 = vadd.xlane.f32.xlu0 %v421_v42  ;;  %v470_v42 = vstv %s861_s6 }
 0x1a3   :  { %v388_v45 = vmax.f32 %v344_v41, 0.0  ;;  %v336_v46 = vadd.f32 %v733_v23, %v335_v44  ;;  %v430_v47 = vsel %vm260_vm1, %v408_v43, 0.0  ;;  %v406_v48 = vmul.f32 %v739_v27, %v383_v40 }
 0x1a4   :  { %431 = vadd.xlane.f32.xlu1 %v430_v47  ;;  %v590_v49 = vpop.f32.mrf.mxu1 }
 0x1a5   :  { %v386_v50 = vmax.f32 %v336_v46, 0.0  ;;  %v347_v51 = vadd.f32 %v590_v49, %v733_v23  ;;  %v424_v52 = vsel %vm260_vm1, %v406_v48, 0.0  ;;  %v411_v53 = vmul.f32 %v739_v27, %v388_v45 }
 0x1a6   :  { %v338_v54 = vpop.f32.mrf.mxu1  ;;  %425 = vadd.xlane.f32.xlu0 %v424_v52 }
 0x1a7   :  { %v389_v55 = vmax.f32 %v347_v51, 0.0  ;;  %v339_v56 = vadd.f32 %v733_v23, %v338_v54  ;;  %v439_v58 = vsel %vm260_vm1, %v411_v53, 0.0  ;;  %v409_v62 = vmul.f32 %v739_v27, %v386_v50 }
 0x1a8   :  { %v593_v57 = vpop.f32.mrf.mxu1 }
 0x1a9   :  { %v387_v59 = vmax.f32 %v339_v56, 0.0  ;;  %v360_v60 = vadd.f32 %v593_v57, %v733_v23  ;;  %v412_v61 = vmul.f32 %v739_v27, %v389_v55  ;;  %v433_v7 = vsel %vm260_vm1, %v409_v62, 0.0 }
 0x1aa   :  { %v351_v63 = vpop.f32.mrf.mxu1  ;;  %440 = vadd.xlane.f32.xlu0 %v439_v58 }
 0x1ab   :  { %v392_v0 = vmax.f32 %v360_v60, 0.0  ;;  %v352_v1 = vadd.f32 %v733_v23, %v351_v63  ;;  %v442_v2 = vsel %vm260_vm1, %v412_v61, 0.0  ;;  %v410_v3 = vmul.f32 %v739_v27, %v387_v59 }
 0x1ac   :  { %443 = vadd.xlane.f32.xlu1 %v442_v2  ;;  %v594_v4 = vpop.f32.mrf.mxu1 }
 0x1ad   :  { %v390_v5 = vmax.f32 %v352_v1, 0.0  ;;  %v363_v6 = vadd.f32 %v594_v4, %v733_v23  ;;  %v415_v8 = vmul.f32 %v739_v27, %v392_v0  ;;  %v436_v12 = vsel %vm260_vm1, %v410_v3, 0.0 }
 0x1ae   :  { %v354_v9 = vpop.f32.mrf.mxu1  ;;  %434 = vadd.xlane.f32.xlu0 %v433_v7 }
 0x1af   :  { %v393_v10 = vmax.f32 %v363_v6, 0.0  ;;  %v355_v11 = vadd.f32 %v733_v23, %v354_v9  ;;  %v451_v14 = vsel %vm260_vm1, %v415_v8, 0.0  ;;  %v413_v18 = vmul.f32 %v739_v27, %v390_v5 }
 0x1b0   :  { %v597_v13 = vpop.f32.mrf.mxu1  ;;  %437 = vadd.xlane.f32.xlu1 %v436_v12 }
 0x1b1   :  { %v391_v15 = vmax.f32 %v355_v11, 0.0  ;;  %v376_v16 = vadd.f32 %v597_v13, %v733_v23  ;;  %v416_v17 = vmul.f32 %v739_v27, %v393_v10  ;;  %v445_v29 = vsel %vm260_vm1, %v413_v18, 0.0 }
 0x1b2   :  { %v367_v19 = vpop.f32.mrf.mxu1  ;;  %452 = vadd.xlane.f32.xlu0 %v451_v14 }
 0x1b3   :  { %v368_v20 = vadd.f32 %v733_v23, %v367_v19  ;;  %v454_v21 = vsel %vm260_vm1, %v416_v17, 0.0  ;;  %v414_v22 = vmul.f32 %v739_v27, %v391_v15  ;;  %v396_v25 = vmax.f32 %v376_v16, 0.0 }
 0x1b4   :  { %v598_v24 = vpop.f32.mrf.mxu1  ;;  %455 = vadd.xlane.f32.xlu1 %v454_v21 }
 0x1b5   :  { %v394_v26 = vmax.f32 %v368_v20, 0.0  ;;  %v379_v28 = vadd.f32 %v598_v24, %v733_v23  ;;  %v448_v32 = vsel %vm260_vm1, %v414_v22, 0.0  ;;  %v419_v37 = vmul.f32 %v739_v27, %v396_v25 }
 0x1b6   :  { %v370_v30 = vpop.f32.mrf.mxu1  ;;  %446 = vadd.xlane.f32.xlu0 %v445_v29 }
 0x1b7   :  { %v371_v31 = vadd.f32 %v733_v23, %v370_v30  ;;  %v417_v33 = vmul.f32 %v739_v27, %v394_v26  ;;  %v397_v34 = vmax.f32 %v379_v28, 0.0  ;;  %v463_v40 = vsel %vm260_vm1, %v419_v37, 0.0 }
 0x1b8   :  { %449 = vadd.xlane.f32.xlu1 %v448_v32 }
 0x1b9   :  { %v395_v35 = vmax.f32 %v371_v31, 0.0  ;;  %v457_v36 = vsel %vm260_vm1, %v417_v33, 0.0  ;;  %v420_v23 = vmul.f32 %v739_v27, %v397_v34 }
 0x1ba   :  { %458 = vadd.xlane.f32.xlu0 %v457_v36 }
 0x1bb   :  { %v418_v38 = vmul.f32 %v739_v27, %v395_v35  ;;  %v466_v41 = vsel %vm260_vm1, %v420_v23, 0.0 }
 0x1bd   :  { %v460_v39 = vsel %vm260_vm1, %v418_v38, 0.0 }
 0x1be   :  { %461 = vadd.xlane.f32.xlu1 %v460_v39  ;;  %464 = vadd.xlane.f32.xlu0 %v463_v40 }
 0x1c2   :  { %467 = vadd.xlane.f32.xlu1 %v466_v41 }
 0x229   :  { %v429_v43 = vpop.xlane.xlu1 %428 }
 0x22a   :  { %v473_v44 = vadd.f32 %v470_v42, %v429_v43 }
 0x22b   :  { %v423_v45 = vpop.xlane.xlu0 %422 }
 0x22c   :  { %490 = vst.msk [vmem:[%s862_s7 + $0x10] sm:$0xff] %vm487_vm2, %v473_v44  ;;  %v471_v46 = vadd.f32 %v470_v42, %v423_v45 }
 0x22d   :  { %v432_v27 = vpop.xlane.xlu1 %431 }
 0x22e   :  { %488 = vst.msk [vmem:[%s862_s7] sm:$0xff] %vm487_vm2, %v471_v46  ;;  %v474_v47 = vadd.f32 %v470_v42, %v432_v27 }
 0x22f   :  { %v426_v48 = vpop.xlane.xlu0 %425 }
 0x230   :  { %491 = vst.msk [vmem:[%s862_s7 + $0x18] sm:$0xff] %vm487_vm2, %v474_v47  ;;  %v472_v49 = vadd.f32 %v470_v42, %v426_v48 }
 0x232   :  { %489 = vst.msk [vmem:[%s862_s7 + $0x8] sm:$0xff] %vm487_vm2, %v472_v49 }
 0x233   :  { %v441_v50 = vpop.xlane.xlu0 %440 }
 0x234   :  { %v477_v51 = vadd.f32 %v470_v42, %v441_v50 }
 0x235   :  { %v444_v52 = vpop.xlane.xlu1 %443 }
 0x236   :  { %494 = vst.msk [vmem:[%s862_s7 + $0x30] sm:$0xff] %vm487_vm2, %v477_v51  ;;  %v478_v53 = vadd.f32 %v470_v42, %v444_v52 }
 0x237   :  { %v435_v54 = vpop.xlane.xlu0 %434 }
 0x238   :  { %495 = vst.msk [vmem:[%s862_s7 + $0x38] sm:$0xff] %vm487_vm2, %v478_v53  ;;  %v475_v55 = vadd.f32 %v470_v42, %v435_v54 }
 0x239   :  { %v438_v56 = vpop.xlane.xlu1 %437 }
 0x23a   :  { %492 = vst.msk [vmem:[%s862_s7 + $0x20] sm:$0xff] %vm487_vm2, %v475_v55  ;;  %v476_v57 = vadd.f32 %v470_v42, %v438_v56 }
 0x23b   :  { %v453_v58 = vpop.xlane.xlu0 %452 }
 0x23c   :  { %493 = vst.msk [vmem:[%s862_s7 + $0x28] sm:$0xff] %vm487_vm2, %v476_v57  ;;  %v481_v59 = vadd.f32 %v470_v42, %v453_v58 }
 0x23d   :  { %v456_v60 = vpop.xlane.xlu1 %455 }
 0x23e   :  { %498 = vst.msk [vmem:[%s862_s7 + $0x50] sm:$0xff] %vm487_vm2, %v481_v59  ;;  %v482_v61 = vadd.f32 %v470_v42, %v456_v60 }
 0x23f   :  { %v447_v62 = vpop.xlane.xlu0 %446 }
 0x240   :  { %499 = vst.msk [vmem:[%s862_s7 + $0x58] sm:$0xff] %vm487_vm2, %v482_v61  ;;  %v479_v63 = vadd.f32 %v470_v42, %v447_v62 }
 0x241   :  { %v450_v0 = vpop.xlane.xlu1 %449 }
 0x242   :  { %496 = vst.msk [vmem:[%s862_s7 + $0x40] sm:$0xff] %vm487_vm2, %v479_v63  ;;  %v480_v1 = vadd.f32 %v470_v42, %v450_v0 }
 0x243   :  { %v459_v2 = vpop.xlane.xlu0 %458 }
 0x244   :  { %497 = vst.msk [vmem:[%s862_s7 + $0x48] sm:$0xff] %vm487_vm2, %v480_v1  ;;  %v483_v3 = vadd.f32 %v470_v42, %v459_v2 }
 0x246   :  { %500 = vst.msk [vmem:[%s862_s7 + $0x60] sm:$0xff] %vm487_vm2, %v483_v3 }
 0x247   :  { %v462_v4 = vpop.xlane.xlu1 %461  ;;  %v465_v5 = vpop.xlane.xlu0 %464 }
 0x248   :  { %v484_v6 = vadd.f32 %v470_v42, %v462_v4  ;;  %v485_v7 = vadd.f32 %v470_v42, %v465_v5 }
 0x24a   :  { %501 = vst.msk [vmem:[%s862_s7 + $0x68] sm:$0xff] %vm487_vm2, %v484_v6  ;;  %502 = vst.msk [vmem:[%s862_s7 + $0x70] sm:$0xff] %vm487_vm2, %v485_v7 }
 0x24b   :  { %v468_v8 = vpop.xlane.xlu1 %467 }
 0x24c   :  { %v486_v9 = vadd.f32 %v470_v42, %v468_v8 }
 0x24e   :  { %503 = vst.msk [vmem:[%s862_s7 + $0x78] sm:$0xff] %vm487_vm2, %v486_v9 }

</bundles_post_ra>
